<compile_context>
chip_gen: v6e
topology: v6e:2x2x1
jax: 0.10.0
libtpu: 0.0.40
codegen_flags: <defaults>
</compile_context>

<pallas_src>
import numpy as np
import jax
import jax.numpy as jnp
from jax import lax
from jax.experimental import pallas as pl
from jax.experimental.pallas import tpu as pltpu

WINDOW_SIZE = 11
SIGMA = 1.5


def _gaussian_1d(size=WINDOW_SIZE, sigma=SIGMA):
    g = np.exp(-((np.arange(size) - size // 2) ** 2) / float(2 * sigma ** 2))
    return (g / g.sum()).astype(np.float32)            # sums to 1, matches torch window


def _toeplitz_blur(n, g):
    """(n, n) banded Toeplitz T with T[i, j] = g[j - i + P]; T @ x == 1-D 'same' gaussian blur
    along the leading axis with zero padding."""
    K = len(g)
    P = K // 2
    T = np.zeros((n, n), np.float32)
    for i in range(n):
        for k in range(K):
            j = i + k - P
            if 0 <= j < n:
                T[i, j] = g[k]
    return T


def _num_tensorcores():
    """Best-effort TensorCore count (v7x has 2/chip; v5e/v6e have 1).  Defaults to 1."""
    try:
        info = pltpu.get_tpu_info()
        for name in ("num_cores", "num_tensorcores", "tensorcore_count", "cores_per_chip"):
            v = getattr(info, name, None)
            if v:
                return int(v)
    except Exception:
        pass
    return 1


def _choose_bn(N, W, max_lanes=1024, min_blocks=1):
    """How many images to pack side-by-side along lanes.  Preference order:
    (a) keep >= min_blocks grid steps (v7x megacore), (b) lane-dense packed width
    (bn*W % 128 == 0), (c) the widest pack."""
    divs = [d for d in range(1, N + 1) if N % d == 0 and d * W <= max_lanes]
    if not divs:
        return 1
    return max(divs, key=lambda d: (N // d >= min_blocks, (d * W) % 128 == 0, d))


def _lane_roll(v, shift, width):
    """Circular lane roll, jnp.roll semantics (out[j] = v[(j - shift) % width])."""
    if shift == 0:
        return v
    if width % 128 == 0:
        return pltpu.roll(v, shift=shift, axis=1)        # XLU lane rotate (free-ish slot)
    # narrow-lane fallback: static slices + lane concat
    return jnp.concatenate([v[:, width - shift:], v[:, :width - shift]], axis=1)


def _make_ssim_kernel(H, W, bn, C1, C2, C3, alpha, beta, gamma, threshold, g_taps, mm_dtype):
    inv_hw = 1.0 / float(H * W)
    bnW = bn * W
    width2 = 2 * bnW
    P = len(g_taps) // 2

    def kernel(gh_ref, seg_ref, a_ref, b_ref, m_ref, out_ref):
        # binary mask + elementwise masking: matches (masks <= thr).float() * img
        maskf = (m_ref[0] <= threshold).astype(jnp.float32)
        x = a_ref[0] * maskf                                    # (H, bnW)
        y = b_ref[0] * maskf

        # ---- vertical blur: ONE MXU matmul for both x and y (fused along lanes) ----
        xy = jnp.concatenate([x, y], axis=1)                    # (H, 2*bnW)
        gh = gh_ref[...]                                        # (H, H), already mm_dtype
        v = jnp.dot(gh.astype(mm_dtype), xy.astype(mm_dtype),
                    preferred_element_type=jnp.float32)         # (H, 2*bnW) f32

        # ---- horizontal blur: 11 lane rolls (XLU) + masked FMA (VPU); zero padding and
        #      packed-image seams enforced by per-lane masks (no cross-image leakage) ----
        lane = lax.broadcasted_iota(jnp.int32, (1, width2), 1) % W
        mu = v * jnp.float32(g_taps[P])                         # center tap, mask all-ones
        for k, gk in enumerate(g_taps):
            d = k - P
            if d == 0:
                continue
            coeff = jnp.where((lane + d >= 0) & (lane + d < W),
                              jnp.float32(gk), jnp.float32(0.0))
            mu = mu + _lane_roll(v, (-d) % width2, width2) * coeff

        mu_x = mu[:, :bnW]
        mu_y = mu[:, bnW:]
        dx = x - mu_x
        dy = y - mu_y

        # per-pixel luminance term; divide via EUP approx reciprocal + 1 Newton step
        num = 2.0 * mu_x * mu_y + C1
        den = mu_x * mu_x + mu_y * mu_y + C1                    # >= C1 > 0
        r = pl.reciprocal(den, approx=True)
        r = r * (2.0 - den * r)
        L = num * r
        if alpha != 1.0:
            L = jnp.power(L, alpha)                             # matches torch L ** alpha

        # ---- fused per-image reductions: one (4H, bnW) @ (bnW, bn) segment matmul ----
        # (reference ssim() uses GLOBAL per-image second moments: .mean(dim=[2,3]))
        stacked = jnp.concatenate([dx * dx, dy * dy, dx * dy, L], axis=0)   # (4H, bnW)
        seg = seg_ref[...]                                                  # (bnW, bn)
        red = jnp.dot(stacked.astype(mm_dtype), seg.astype(mm_dtype),
                      preferred_element_type=jnp.float32)                   # (4H, bn)
        sigma_x = jnp.sum(red[0 * H:1 * H], axis=0, keepdims=True) * inv_hw  # (1, bn)
        sigma_y = jnp.sum(red[1 * H:2 * H], axis=0, keepdims=True) * inv_hw
        sigma_xy = jnp.sum(red[2 * H:3 * H], axis=0, keepdims=True) * inv_hw
        mean_L = jnp.sum(red[3 * H:4 * H], axis=0, keepdims=True) * inv_hw

        sx = jnp.sqrt(sigma_x)
        sy = jnp.sqrt(sigma_y)
        Cc = (2.0 * sx * sy + C2) / (sigma_x + sigma_y + C2)    # per-image scalars
        Sc = (sigma_xy + C3) / (sx * sy + C3)
        if beta != 1.0:
            Cc = jnp.power(Cc, beta)
        if gamma != 1.0:
            Sc = jnp.power(Sc, gamma)

        out_ref[...] = (mean_L * Cc * Sc).astype(out_ref.dtype)  # per-image SSIM

    return kernel


def _vmem_limit_bytes(H, bnW, bn):
    slab = H * bnW * 4
    est = slab * (3 * 2 + 20) + 2 * (H * H * 2) + 2 * (bnW * bn * 2) + (1 << 20)
    return int(min(64 << 20, max(32 << 20, 2 * est)))   # cap at v7x physical VMEM


def ssim_loss_pallas(a, b, m, *, C1=0.0004, C2=0.0036,
                     alpha=1.0, beta=1.0, gamma=1.0, threshold=0.8,
                     matmul_dtype=jnp.bfloat16):
    """a, b, m: (N, H, W) float32.  Returns scalar mean(1 - ssim), as SSIMLoss.forward."""
    N, H, W = a.shape
    min_blocks = 2 if _num_tensorcores() >= 2 else 1     # keep both v7x TCs busy; neutral elsewhere
    bn = _choose_bn(N, W, max_lanes=1024, min_blocks=min_blocks)
    nb = N // bn
    bnW = bn * W

    # TODO(synk): for large N*H*W fold the lane-packing into the kernel (avoids an extra
    # HBM read+write of a, b, m); at these shapes the XLA transpose is negligible.
    def pack(x):   # (N, H, W) -> (nb, H, bn*W): bn images side-by-side along lanes
        return jnp.transpose(x.reshape(nb, bn, H, W), (0, 2, 1, 3)).reshape(nb, H, bnW)

    ap, bp, mp = pack(a), pack(b), pack(m)

    g = _gaussian_1d()
    gh = jnp.asarray(_toeplitz_blur(H, g), dtype=matmul_dtype)   # (H, H) vertical blur band
    seg_np = np.zeros((bnW, bn), np.float32)                     # per-image segment-sum matrix
    for k in range(bn):
        seg_np[k * W:(k + 1) * W, k] = 1.0
    seg = jnp.asarray(seg_np, dtype=matmul_dtype)

    kernel = _make_ssim_kernel(H, W, bn, C1, C2, C2 / 2.0, alpha, beta, gamma,
                               threshold, tuple(float(t) for t in g), matmul_dtype)

    img_spec = pl.BlockSpec((1, H, bnW), lambda i: (i, 0, 0))
    full2d = lambda shape: pl.BlockSpec(shape, lambda i: (0, 0))

    out = pl.pallas_call(
        kernel,
        out_shape=jax.ShapeDtypeStruct((nb, bn), jnp.float32),
        grid_spec=pltpu.PrefetchScalarGridSpec(
            num_scalar_prefetch=0,
            grid=(nb,),
            in_specs=[full2d((H, H)), full2d((bnW, bn)),
                      img_spec, img_spec, img_spec],
            out_specs=pl.BlockSpec((1, bn), lambda i: (i, 0)),
        ),
        compiler_params=pltpu.CompilerParams(
            dimension_semantics=("parallel",),
            vmem_limit_bytes=_vmem_limit_bytes(H, bnW, bn)),
    )(gh, seg, ap, bp, mp)

    return 1.0 - jnp.mean(out)


def _extract_patches(x, tops, lefts, sh, sw):
    """x: (B, H, W); tops/lefts: (B, num_sub) int32 -> (B*num_sub, sh, sw)."""
    # TODO(synk): gather patches in-kernel via scalar-prefetched tops/lefts (manual DMA on a
    # memory_space=pl.ANY image ref) to remove this extra HBM round trip for large batches.
    def per_image(img, ts, ls):
        return jax.vmap(lambda t, l: lax.dynamic_slice(img, (t, l), (sh, sw)))(ts, ls)
    patches = jax.vmap(per_image)(x, tops, lefts)               # (B, num_sub, sh, sw)
    B, ns = tops.shape
    return patches.reshape(B * ns, sh, sw)


def process_subimg_and_compute_loss_forward(
        images_a, images_b, masks, *,
        num_subimages=10, subimage_size=(32, 32), threshold=0.8,
        img_mean_percent=0.5, ssim_alpha=1.0, ssim_beta=1.0, ssim_gamma=1.0,
        crop_key=None):
    B, C, H, W = images_a.shape
    assert C == 1, "SSIMLoss in the reference module only supports 1 channel (groups=1 conv)"
    a = images_a[:, 0].astype(jnp.float32)
    b = images_b[:, 0].astype(jnp.float32)
    m = masks[:, 0].astype(jnp.float32)

    # total_loss: SSIM(alpha=beta=gamma=1) on masked full images
    total_loss = ssim_loss_pallas(a, b, m, alpha=1.0, beta=1.0, gamma=1.0,
                                  threshold=threshold)

    if num_subimages > 0:
        sh, sw = subimage_size
        # TODO(synk): PyTorch draws crop offsets with Python's `random`; here we use a
        # deterministic jax.random key (same distribution, different RNG source).
        if crop_key is None:
            crop_key = jax.random.PRNGKey(0)
        kt, kl = jax.random.split(crop_key)
        tops = jax.random.randint(kt, (B, num_subimages), 0, H - sh + 1)
        lefts = jax.random.randint(kl, (B, num_subimages), 0, W - sw + 1)
        pa = _extract_patches(a, tops, lefts, sh, sw)
        pb = _extract_patches(b, tops, lefts, sh, sw)
        pm = _extract_patches(m, tops, lefts, sh, sw)
        l1_loss = ssim_loss_pallas(pa, pb, pm, alpha=ssim_alpha, beta=ssim_beta,
                                   gamma=ssim_gamma, threshold=threshold)
    elif num_subimages == 0:
        l1_loss = jnp.float32(0.0)
    else:
        l1_loss = ssim_loss_pallas(a, b, m, alpha=ssim_alpha, beta=ssim_beta,
                                   gamma=ssim_gamma, threshold=threshold)

    return l1_loss * (1.0 - img_mean_percent) + total_loss * img_mean_percent


if __name__ == "__main__":
    key = jax.random.PRNGKey(0)
    k1, k2, k3, k4 = jax.random.split(key, 4)

    B, C, H, W = 2, 1, 32, 32
    images_a = jax.random.uniform(k1, (B, C, H, W), jnp.float32, -1.0, 1.0)
    images_b = jax.random.uniform(k2, (B, C, H, W), jnp.float32, -1.0, 1.0)
    masks = jax.random.uniform(k3, (B, C, H, W), jnp.float32, 0.0, 1.0)

    loss = process_subimg_and_compute_loss_forward(
        images_a, images_b, masks,
        num_subimages=4, subimage_size=(16, 16), threshold=0.8,
        img_mean_percent=0.5, ssim_alpha=1.0, ssim_beta=1.0, ssim_gamma=1.0,
        crop_key=k4)
    loss = jax.block_until_ready(loss)
    assert jnp.isfinite(loss)
    print("KERNEL_OK")
</pallas_src>

<mosaic_0001>
module attributes {stable_mosaic.version = 11 : i64} {
  func.func @kernel(%arg0: i32, %arg1: memref<32x32xbf16, #tpu.memory_space<vmem>>, %arg2: memref<64x2xbf16, #tpu.memory_space<vmem>>, %arg3: memref<1x32x64xf32, #tpu.memory_space<vmem>>, %arg4: memref<1x32x64xf32, #tpu.memory_space<vmem>>, %arg5: memref<1x32x64xf32, #tpu.memory_space<vmem>>, %arg6: memref<1x2xf32, #tpu.memory_space<vmem>>) attributes {dimension_semantics = [#tpu.dimension_semantics<parallel>], iteration_bounds = array<i64: 1>, scalar_prefetch = 0 : i64, scratch_operands = 0 : i64, tpu.core_type = #tpu.core_type<tc>, window_params = [{pipeline_mode = #tpu.pipeline_mode<synchronous>, transform_indices = @transform_0, window_bounds = array<i64: 32, 32>}, {pipeline_mode = #tpu.pipeline_mode<synchronous>, transform_indices = @transform_1, window_bounds = array<i64: 64, 2>}, {transform_indices = @transform_2, window_bounds = array<i64: 1, 32, 64>}, {transform_indices = @transform_3, window_bounds = array<i64: 1, 32, 64>}, {transform_indices = @transform_4, window_bounds = array<i64: 1, 32, 64>}, {transform_indices = @transform_5, window_bounds = array<i64: 1, 2>}]} {
    %c0 = arith.constant 0 : index
    %c0_0 = arith.constant 0 : index
    %c0_1 = arith.constant 0 : index
    %0 = vector.load %arg5[%c0, %c0_0, %c0_1] : memref<1x32x64xf32, #tpu.memory_space<vmem>>, vector<1x32x64xf32>
    %1 = vector.shape_cast %0 : vector<1x32x64xf32> to vector<32x64xf32>
    %cst = arith.constant 8.000000e-01 : f32
    %2 = vector.broadcast %cst : f32 to vector<32x64xf32>
    %3 = arith.cmpf ole, %1, %2 : vector<32x64xf32>
    %4 = arith.extui %3 : vector<32x64xi1> to vector<32x64xi32>
    %5 = arith.sitofp %4 : vector<32x64xi32> to vector<32x64xf32>
    %c0_2 = arith.constant 0 : index
    %c0_3 = arith.constant 0 : index
    %c0_4 = arith.constant 0 : index
    %6 = vector.load %arg3[%c0_2, %c0_3, %c0_4] : memref<1x32x64xf32, #tpu.memory_space<vmem>>, vector<1x32x64xf32>
    %7 = vector.shape_cast %6 : vector<1x32x64xf32> to vector<32x64xf32>
    %8 = arith.mulf %7, %5 : vector<32x64xf32>
    %c0_5 = arith.constant 0 : index
    %c0_6 = arith.constant 0 : index
    %c0_7 = arith.constant 0 : index
    %9 = vector.load %arg4[%c0_5, %c0_6, %c0_7] : memref<1x32x64xf32, #tpu.memory_space<vmem>>, vector<1x32x64xf32>
    %10 = vector.shape_cast %9 : vector<1x32x64xf32> to vector<32x64xf32>
    %11 = arith.mulf %10, %5 : vector<32x64xf32>
    %12 = tpu.concatenate %8, %11 in 1 : vector<32x64xf32>, vector<32x64xf32> -> vector<32x128xf32>
    %c0_8 = arith.constant 0 : index
    %c0_9 = arith.constant 0 : index
    %13 = vector.load %arg1[%c0_8, %c0_9] : memref<32x32xbf16, #tpu.memory_space<vmem>>, vector<32x32xbf16>
    %14 = arith.truncf %12 : vector<32x128xf32> to vector<32x128xbf16>
    %cst_10 = arith.constant dense<0.000000e+00> : vector<32x128xf32>
    %15 = tpu.matmul %13, %14, %cst_10 {dimension_numbers = #tpu.dot_dimension_numbers<[1], [0], [0], [1], [0, 0, 1, 1], [], []>} : vector<32x32xbf16>, vector<32x128xbf16>, vector<32x128xf32> -> vector<32x128xf32>
    %16 = tpu.iota {dimensions = array<i32: 1>} : vector<1x128xi32>
    %c32_i32 = arith.constant 32 : i32
    %c0_i32 = arith.constant 0 : i32
    %17 = arith.cmpi eq, %c32_i32, %c0_i32 : i32
    %c1_i32 = arith.constant 1 : i32
    %18 = arith.select %17, %c1_i32, %c32_i32 : i32
    %19 = vector.broadcast %18 : i32 to vector<1x128xi32>
    %20 = arith.remsi %16, %19 : vector<1x128xi32>
    %c0_i32_11 = arith.constant 0 : i32
    %21 = vector.broadcast %c0_i32_11 : i32 to vector<1x128xi32>
    %22 = arith.cmpi ne, %20, %21 : vector<1x128xi32>
    %c0_i32_12 = arith.constant 0 : i32
    %23 = vector.broadcast %c0_i32_12 : i32 to vector<1x128xi32>
    %24 = arith.cmpi slt, %20, %23 : vector<1x128xi32>
    %c0_i32_13 = arith.constant 0 : i32
    %25 = arith.cmpi slt, %18, %c0_i32_13 : i32
    %26 = vector.broadcast %25 : i1 to vector<1x128xi1>
    %27 = vector.broadcast %26 : vector<1x128xi1> to vector<1x128xi1>
    %28 = arith.xori %24, %27 : vector<1x128xi1>
    %29 = arith.andi %28, %22 : vector<1x128xi1>
    %30 = vector.broadcast %18 : i32 to vector<1x128xi32>
    %31 = arith.addi %20, %30 : vector<1x128xi32>
    %32 = arith.select %29, %31, %20 : vector<1x128xi1>, vector<1x128xi32>
    %cst_14 = arith.constant 0.266011715 : f32
    %33 = vector.broadcast %cst_14 : f32 to vector<32x128xf32>
    %34 = arith.mulf %15, %33 : vector<32x128xf32>
    %c-5_i32 = arith.constant -5 : i32
    %35 = vector.broadcast %c-5_i32 : i32 to vector<1x128xi32>
    %36 = arith.addi %32, %35 : vector<1x128xi32>
    %c0_i32_15 = arith.constant 0 : i32
    %37 = vector.broadcast %c0_i32_15 : i32 to vector<1x128xi32>
    %38 = arith.cmpi sge, %36, %37 : vector<1x128xi32>
    %c-5_i32_16 = arith.constant -5 : i32
    %39 = vector.broadcast %c-5_i32_16 : i32 to vector<1x128xi32>
    %40 = arith.addi %32, %39 : vector<1x128xi32>
    %c32_i32_17 = arith.constant 32 : i32
    %41 = vector.broadcast %c32_i32_17 : i32 to vector<1x128xi32>
    %42 = arith.cmpi slt, %40, %41 : vector<1x128xi32>
    %43 = arith.andi %38, %42 : vector<1x128xi1>
    %cst_18 = arith.constant 0.00102838012 : f32
    %cst_19 = arith.constant 0.000000e+00 : f32
    %44 = vector.broadcast %cst_18 : f32 to vector<1x128xf32>
    %45 = vector.broadcast %cst_19 : f32 to vector<1x128xf32>
    %46 = arith.select %43, %44, %45 : vector<1x128xi1>, vector<1x128xf32>
    %c5_i32 = arith.constant 5 : i32
    %47 = tpu.dynamic_rotate %15 by %c5_i32 dim 1 : vector<32x128xf32>, i32 -> vector<32x128xf32>
    %48 = vector.broadcast %46 : vector<1x128xf32> to vector<32x128xf32>
    %49 = arith.mulf %47, %48 : vector<32x128xf32>
    %50 = arith.addf %34, %49 : vector<32x128xf32>
    %c-4_i32 = arith.constant -4 : i32
    %51 = vector.broadcast %c-4_i32 : i32 to vector<1x128xi32>
    %52 = arith.addi %32, %51 : vector<1x128xi32>
    %c0_i32_20 = arith.constant 0 : i32
    %53 = vector.broadcast %c0_i32_20 : i32 to vector<1x128xi32>
    %54 = arith.cmpi sge, %52, %53 : vector<1x128xi32>
    %c-4_i32_21 = arith.constant -4 : i32
    %55 = vector.broadcast %c-4_i32_21 : i32 to vector<1x128xi32>
    %56 = arith.addi %32, %55 : vector<1x128xi32>
    %c32_i32_22 = arith.constant 32 : i32
    %57 = vector.broadcast %c32_i32_22 : i32 to vector<1x128xi32>
    %58 = arith.cmpi slt, %56, %57 : vector<1x128xi32>
    %59 = arith.andi %54, %58 : vector<1x128xi1>
    %cst_23 = arith.constant 0.00759875821 : f32
    %cst_24 = arith.constant 0.000000e+00 : f32
    %60 = vector.broadcast %cst_23 : f32 to vector<1x128xf32>
    %61 = vector.broadcast %cst_24 : f32 to vector<1x128xf32>
    %62 = arith.select %59, %60, %61 : vector<1x128xi1>, vector<1x128xf32>
    %c4_i32 = arith.constant 4 : i32
    %63 = tpu.dynamic_rotate %15 by %c4_i32 dim 1 : vector<32x128xf32>, i32 -> vector<32x128xf32>
    %64 = vector.broadcast %62 : vector<1x128xf32> to vector<32x128xf32>
    %65 = arith.mulf %63, %64 : vector<32x128xf32>
    %66 = arith.addf %50, %65 : vector<32x128xf32>
    %c-3_i32 = arith.constant -3 : i32
    %67 = vector.broadcast %c-3_i32 : i32 to vector<1x128xi32>
    %68 = arith.addi %32, %67 : vector<1x128xi32>
    %c0_i32_25 = arith.constant 0 : i32
    %69 = vector.broadcast %c0_i32_25 : i32 to vector<1x128xi32>
    %70 = arith.cmpi sge, %68, %69 : vector<1x128xi32>
    %c-3_i32_26 = arith.constant -3 : i32
    %71 = vector.broadcast %c-3_i32_26 : i32 to vector<1x128xi32>
    %72 = arith.addi %32, %71 : vector<1x128xi32>
    %c32_i32_27 = arith.constant 32 : i32
    %73 = vector.broadcast %c32_i32_27 : i32 to vector<1x128xi32>
    %74 = arith.cmpi slt, %72, %73 : vector<1x128xi32>
    %75 = arith.andi %70, %74 : vector<1x128xi1>
    %cst_28 = arith.constant 0.0360007733 : f32
    %cst_29 = arith.constant 0.000000e+00 : f32
    %76 = vector.broadcast %cst_28 : f32 to vector<1x128xf32>
    %77 = vector.broadcast %cst_29 : f32 to vector<1x128xf32>
    %78 = arith.select %75, %76, %77 : vector<1x128xi1>, vector<1x128xf32>
    %c3_i32 = arith.constant 3 : i32
    %79 = tpu.dynamic_rotate %15 by %c3_i32 dim 1 : vector<32x128xf32>, i32 -> vector<32x128xf32>
    %80 = vector.broadcast %78 : vector<1x128xf32> to vector<32x128xf32>
    %81 = arith.mulf %79, %80 : vector<32x128xf32>
    %82 = arith.addf %66, %81 : vector<32x128xf32>
    %c-2_i32 = arith.constant -2 : i32
    %83 = vector.broadcast %c-2_i32 : i32 to vector<1x128xi32>
    %84 = arith.addi %32, %83 : vector<1x128xi32>
    %c0_i32_30 = arith.constant 0 : i32
    %85 = vector.broadcast %c0_i32_30 : i32 to vector<1x128xi32>
    %86 = arith.cmpi sge, %84, %85 : vector<1x128xi32>
    %c-2_i32_31 = arith.constant -2 : i32
    %87 = vector.broadcast %c-2_i32_31 : i32 to vector<1x128xi32>
    %88 = arith.addi %32, %87 : vector<1x128xi32>
    %c32_i32_32 = arith.constant 32 : i32
    %89 = vector.broadcast %c32_i32_32 : i32 to vector<1x128xi32>
    %90 = arith.cmpi slt, %88, %89 : vector<1x128xi32>
    %91 = arith.andi %86, %90 : vector<1x128xi1>
    %cst_33 = arith.constant 0.109360687 : f32
    %cst_34 = arith.constant 0.000000e+00 : f32
    %92 = vector.broadcast %cst_33 : f32 to vector<1x128xf32>
    %93 = vector.broadcast %cst_34 : f32 to vector<1x128xf32>
    %94 = arith.select %91, %92, %93 : vector<1x128xi1>, vector<1x128xf32>
    %c2_i32 = arith.constant 2 : i32
    %95 = tpu.dynamic_rotate %15 by %c2_i32 dim 1 : vector<32x128xf32>, i32 -> vector<32x128xf32>
    %96 = vector.broadcast %94 : vector<1x128xf32> to vector<32x128xf32>
    %97 = arith.mulf %95, %96 : vector<32x128xf32>
    %98 = arith.addf %82, %97 : vector<32x128xf32>
    %c-1_i32 = arith.constant -1 : i32
    %99 = vector.broadcast %c-1_i32 : i32 to vector<1x128xi32>
    %100 = arith.addi %32, %99 : vector<1x128xi32>
    %c0_i32_35 = arith.constant 0 : i32
    %101 = vector.broadcast %c0_i32_35 : i32 to vector<1x128xi32>
    %102 = arith.cmpi sge, %100, %101 : vector<1x128xi32>
    %c-1_i32_36 = arith.constant -1 : i32
    %103 = vector.broadcast %c-1_i32_36 : i32 to vector<1x128xi32>
    %104 = arith.addi %32, %103 : vector<1x128xi32>
    %c32_i32_37 = arith.constant 32 : i32
    %105 = vector.broadcast %c32_i32_37 : i32 to vector<1x128xi32>
    %106 = arith.cmpi slt, %104, %105 : vector<1x128xi32>
    %107 = arith.andi %102, %106 : vector<1x128xi1>
    %cst_38 = arith.constant 0.213005543 : f32
    %cst_39 = arith.constant 0.000000e+00 : f32
    %108 = vector.broadcast %cst_38 : f32 to vector<1x128xf32>
    %109 = vector.broadcast %cst_39 : f32 to vector<1x128xf32>
    %110 = arith.select %107, %108, %109 : vector<1x128xi1>, vector<1x128xf32>
    %c1_i32_40 = arith.constant 1 : i32
    %111 = tpu.dynamic_rotate %15 by %c1_i32_40 dim 1 : vector<32x128xf32>, i32 -> vector<32x128xf32>
    %112 = vector.broadcast %110 : vector<1x128xf32> to vector<32x128xf32>
    %113 = arith.mulf %111, %112 : vector<32x128xf32>
    %114 = arith.addf %98, %113 : vector<32x128xf32>
    %c1_i32_41 = arith.constant 1 : i32
    %115 = vector.broadcast %c1_i32_41 : i32 to vector<1x128xi32>
    %116 = arith.addi %32, %115 : vector<1x128xi32>
    %c0_i32_42 = arith.constant 0 : i32
    %117 = vector.broadcast %c0_i32_42 : i32 to vector<1x128xi32>
    %118 = arith.cmpi sge, %116, %117 : vector<1x128xi32>
    %c1_i32_43 = arith.constant 1 : i32
    %119 = vector.broadcast %c1_i32_43 : i32 to vector<1x128xi32>
    %120 = arith.addi %32, %119 : vector<1x128xi32>
    %c32_i32_44 = arith.constant 32 : i32
    %121 = vector.broadcast %c32_i32_44 : i32 to vector<1x128xi32>
    %122 = arith.cmpi slt, %120, %121 : vector<1x128xi32>
    %123 = arith.andi %118, %122 : vector<1x128xi1>
    %cst_45 = arith.constant 0.213005543 : f32
    %cst_46 = arith.constant 0.000000e+00 : f32
    %124 = vector.broadcast %cst_45 : f32 to vector<1x128xf32>
    %125 = vector.broadcast %cst_46 : f32 to vector<1x128xf32>
    %126 = arith.select %123, %124, %125 : vector<1x128xi1>, vector<1x128xf32>
    %c127_i32 = arith.constant 127 : i32
    %127 = tpu.dynamic_rotate %15 by %c127_i32 dim 1 : vector<32x128xf32>, i32 -> vector<32x128xf32>
    %128 = vector.broadcast %126 : vector<1x128xf32> to vector<32x128xf32>
    %129 = arith.mulf %127, %128 : vector<32x128xf32>
    %130 = arith.addf %114, %129 : vector<32x128xf32>
    %c2_i32_47 = arith.constant 2 : i32
    %131 = vector.broadcast %c2_i32_47 : i32 to vector<1x128xi32>
    %132 = arith.addi %32, %131 : vector<1x128xi32>
    %c0_i32_48 = arith.constant 0 : i32
    %133 = vector.broadcast %c0_i32_48 : i32 to vector<1x128xi32>
    %134 = arith.cmpi sge, %132, %133 : vector<1x128xi32>
    %c2_i32_49 = arith.constant 2 : i32
    %135 = vector.broadcast %c2_i32_49 : i32 to vector<1x128xi32>
    %136 = arith.addi %32, %135 : vector<1x128xi32>
    %c32_i32_50 = arith.constant 32 : i32
    %137 = vector.broadcast %c32_i32_50 : i32 to vector<1x128xi32>
    %138 = arith.cmpi slt, %136, %137 : vector<1x128xi32>
    %139 = arith.andi %134, %138 : vector<1x128xi1>
    %cst_51 = arith.constant 0.109360687 : f32
    %cst_52 = arith.constant 0.000000e+00 : f32
    %140 = vector.broadcast %cst_51 : f32 to vector<1x128xf32>
    %141 = vector.broadcast %cst_52 : f32 to vector<1x128xf32>
    %142 = arith.select %139, %140, %141 : vector<1x128xi1>, vector<1x128xf32>
    %c126_i32 = arith.constant 126 : i32
    %143 = tpu.dynamic_rotate %15 by %c126_i32 dim 1 : vector<32x128xf32>, i32 -> vector<32x128xf32>
    %144 = vector.broadcast %142 : vector<1x128xf32> to vector<32x128xf32>
    %145 = arith.mulf %143, %144 : vector<32x128xf32>
    %146 = arith.addf %130, %145 : vector<32x128xf32>
    %c3_i32_53 = arith.constant 3 : i32
    %147 = vector.broadcast %c3_i32_53 : i32 to vector<1x128xi32>
    %148 = arith.addi %32, %147 : vector<1x128xi32>
    %c0_i32_54 = arith.constant 0 : i32
    %149 = vector.broadcast %c0_i32_54 : i32 to vector<1x128xi32>
    %150 = arith.cmpi sge, %148, %149 : vector<1x128xi32>
    %c3_i32_55 = arith.constant 3 : i32
    %151 = vector.broadcast %c3_i32_55 : i32 to vector<1x128xi32>
    %152 = arith.addi %32, %151 : vector<1x128xi32>
    %c32_i32_56 = arith.constant 32 : i32
    %153 = vector.broadcast %c32_i32_56 : i32 to vector<1x128xi32>
    %154 = arith.cmpi slt, %152, %153 : vector<1x128xi32>
    %155 = arith.andi %150, %154 : vector<1x128xi1>
    %cst_57 = arith.constant 0.0360007733 : f32
    %cst_58 = arith.constant 0.000000e+00 : f32
    %156 = vector.broadcast %cst_57 : f32 to vector<1x128xf32>
    %157 = vector.broadcast %cst_58 : f32 to vector<1x128xf32>
    %158 = arith.select %155, %156, %157 : vector<1x128xi1>, vector<1x128xf32>
    %c125_i32 = arith.constant 125 : i32
    %159 = tpu.dynamic_rotate %15 by %c125_i32 dim 1 : vector<32x128xf32>, i32 -> vector<32x128xf32>
    %160 = vector.broadcast %158 : vector<1x128xf32> to vector<32x128xf32>
    %161 = arith.mulf %159, %160 : vector<32x128xf32>
    %162 = arith.addf %146, %161 : vector<32x128xf32>
    %c4_i32_59 = arith.constant 4 : i32
    %163 = vector.broadcast %c4_i32_59 : i32 to vector<1x128xi32>
    %164 = arith.addi %32, %163 : vector<1x128xi32>
    %c0_i32_60 = arith.constant 0 : i32
    %165 = vector.broadcast %c0_i32_60 : i32 to vector<1x128xi32>
    %166 = arith.cmpi sge, %164, %165 : vector<1x128xi32>
    %c4_i32_61 = arith.constant 4 : i32
    %167 = vector.broadcast %c4_i32_61 : i32 to vector<1x128xi32>
    %168 = arith.addi %32, %167 : vector<1x128xi32>
    %c32_i32_62 = arith.constant 32 : i32
    %169 = vector.broadcast %c32_i32_62 : i32 to vector<1x128xi32>
    %170 = arith.cmpi slt, %168, %169 : vector<1x128xi32>
    %171 = arith.andi %166, %170 : vector<1x128xi1>
    %cst_63 = arith.constant 0.00759875821 : f32
    %cst_64 = arith.constant 0.000000e+00 : f32
    %172 = vector.broadcast %cst_63 : f32 to vector<1x128xf32>
    %173 = vector.broadcast %cst_64 : f32 to vector<1x128xf32>
    %174 = arith.select %171, %172, %173 : vector<1x128xi1>, vector<1x128xf32>
    %c124_i32 = arith.constant 124 : i32
    %175 = tpu.dynamic_rotate %15 by %c124_i32 dim 1 : vector<32x128xf32>, i32 -> vector<32x128xf32>
    %176 = vector.broadcast %174 : vector<1x128xf32> to vector<32x128xf32>
    %177 = arith.mulf %175, %176 : vector<32x128xf32>
    %178 = arith.addf %162, %177 : vector<32x128xf32>
    %c5_i32_65 = arith.constant 5 : i32
    %179 = vector.broadcast %c5_i32_65 : i32 to vector<1x128xi32>
    %180 = arith.addi %32, %179 : vector<1x128xi32>
    %c0_i32_66 = arith.constant 0 : i32
    %181 = vector.broadcast %c0_i32_66 : i32 to vector<1x128xi32>
    %182 = arith.cmpi sge, %180, %181 : vector<1x128xi32>
    %c5_i32_67 = arith.constant 5 : i32
    %183 = vector.broadcast %c5_i32_67 : i32 to vector<1x128xi32>
    %184 = arith.addi %32, %183 : vector<1x128xi32>
    %c32_i32_68 = arith.constant 32 : i32
    %185 = vector.broadcast %c32_i32_68 : i32 to vector<1x128xi32>
    %186 = arith.cmpi slt, %184, %185 : vector<1x128xi32>
    %187 = arith.andi %182, %186 : vector<1x128xi1>
    %cst_69 = arith.constant 0.00102838012 : f32
    %cst_70 = arith.constant 0.000000e+00 : f32
    %188 = vector.broadcast %cst_69 : f32 to vector<1x128xf32>
    %189 = vector.broadcast %cst_70 : f32 to vector<1x128xf32>
    %190 = arith.select %187, %188, %189 : vector<1x128xi1>, vector<1x128xf32>
    %c123_i32 = arith.constant 123 : i32
    %191 = tpu.dynamic_rotate %15 by %c123_i32 dim 1 : vector<32x128xf32>, i32 -> vector<32x128xf32>
    %192 = vector.broadcast %190 : vector<1x128xf32> to vector<32x128xf32>
    %193 = arith.mulf %191, %192 : vector<32x128xf32>
    %194 = arith.addf %178, %193 : vector<32x128xf32>
    %195 = vector.extract_strided_slice %194 {offsets = [0, 0], sizes = [32, 64], strides = [1, 1]} : vector<32x128xf32> to vector<32x64xf32>
    %196 = vector.extract_strided_slice %194 {offsets = [0, 64], sizes = [32, 64], strides = [1, 1]} : vector<32x128xf32> to vector<32x64xf32>
    %197 = arith.subf %8, %195 : vector<32x64xf32>
    %198 = arith.subf %11, %196 : vector<32x64xf32>
    %cst_71 = arith.constant 2.000000e+00 : f32
    %199 = vector.broadcast %cst_71 : f32 to vector<32x64xf32>
    %200 = arith.mulf %199, %195 : vector<32x64xf32>
    %201 = arith.mulf %200, %196 : vector<32x64xf32>
    %cst_72 = arith.constant 4.000000e-04 : f32
    %202 = vector.broadcast %cst_72 : f32 to vector<32x64xf32>
    %203 = arith.addf %201, %202 : vector<32x64xf32>
    %204 = arith.mulf %195, %195 : vector<32x64xf32>
    %205 = arith.mulf %196, %196 : vector<32x64xf32>
    %206 = arith.addf %204, %205 : vector<32x64xf32>
    %cst_73 = arith.constant 4.000000e-04 : f32
    %207 = vector.broadcast %cst_73 : f32 to vector<32x64xf32>
    %208 = arith.addf %206, %207 : vector<32x64xf32>
    %209 = tpu.reciprocal %208 {approx = true} : vector<32x64xf32> -> vector<32x64xf32>
    %210 = arith.mulf %208, %209 : vector<32x64xf32>
    %cst_74 = arith.constant 2.000000e+00 : f32
    %211 = vector.broadcast %cst_74 : f32 to vector<32x64xf32>
    %212 = arith.subf %211, %210 : vector<32x64xf32>
    %213 = arith.mulf %209, %212 : vector<32x64xf32>
    %214 = arith.mulf %203, %213 : vector<32x64xf32>
    %215 = arith.mulf %197, %197 : vector<32x64xf32>
    %216 = arith.mulf %198, %198 : vector<32x64xf32>
    %217 = arith.mulf %197, %198 : vector<32x64xf32>
    %218 = tpu.concatenate %215, %216, %217, %214 in 0 : vector<32x64xf32>, vector<32x64xf32>, vector<32x64xf32>, vector<32x64xf32> -> vector<128x64xf32>
    %c0_75 = arith.constant 0 : index
    %c0_76 = arith.constant 0 : index
    %219 = vector.load %arg2[%c0_75, %c0_76] : memref<64x2xbf16, #tpu.memory_space<vmem>>, vector<64x2xbf16>
    %220 = arith.truncf %218 : vector<128x64xf32> to vector<128x64xbf16>
    %cst_77 = arith.constant dense<0.000000e+00> : vector<128x2xf32>
    %221 = tpu.matmul %220, %219, %cst_77 {dimension_numbers = #tpu.dot_dimension_numbers<[1], [0], [0], [1], [0, 0, 1, 1], [], []>} : vector<128x64xbf16>, vector<64x2xbf16>, vector<128x2xf32> -> vector<128x2xf32>
    %222 = vector.extract_strided_slice %221 {offsets = [0, 0], sizes = [32, 2], strides = [1, 1]} : vector<128x2xf32> to vector<32x2xf32>
    %cst_78 = arith.constant dense<0.000000e+00> : vector<2xf32>
    %223 = vector.multi_reduction <add>, %222, %cst_78 [0] : vector<32x2xf32> to vector<2xf32>
    %224 = vector.shape_cast %223 : vector<2xf32> to vector<1x2xf32>
    %cst_79 = arith.constant 9.765625E-4 : f32
    %225 = vector.broadcast %cst_79 : f32 to vector<1x2xf32>
    %226 = arith.mulf %224, %225 : vector<1x2xf32>
    %227 = vector.extract_strided_slice %221 {offsets = [32, 0], sizes = [32, 2], strides = [1, 1]} : vector<128x2xf32> to vector<32x2xf32>
    %cst_80 = arith.constant dense<0.000000e+00> : vector<2xf32>
    %228 = vector.multi_reduction <add>, %227, %cst_80 [0] : vector<32x2xf32> to vector<2xf32>
    %229 = vector.shape_cast %228 : vector<2xf32> to vector<1x2xf32>
    %cst_81 = arith.constant 9.765625E-4 : f32
    %230 = vector.broadcast %cst_81 : f32 to vector<1x2xf32>
    %231 = arith.mulf %229, %230 : vector<1x2xf32>
    %232 = vector.extract_strided_slice %221 {offsets = [64, 0], sizes = [32, 2], strides = [1, 1]} : vector<128x2xf32> to vector<32x2xf32>
    %cst_82 = arith.constant dense<0.000000e+00> : vector<2xf32>
    %233 = vector.multi_reduction <add>, %232, %cst_82 [0] : vector<32x2xf32> to vector<2xf32>
    %234 = vector.shape_cast %233 : vector<2xf32> to vector<1x2xf32>
    %cst_83 = arith.constant 9.765625E-4 : f32
    %235 = vector.broadcast %cst_83 : f32 to vector<1x2xf32>
    %236 = arith.mulf %234, %235 : vector<1x2xf32>
    %237 = vector.extract_strided_slice %221 {offsets = [96, 0], sizes = [32, 2], strides = [1, 1]} : vector<128x2xf32> to vector<32x2xf32>
    %cst_84 = arith.constant dense<0.000000e+00> : vector<2xf32>
    %238 = vector.multi_reduction <add>, %237, %cst_84 [0] : vector<32x2xf32> to vector<2xf32>
    %239 = vector.shape_cast %238 : vector<2xf32> to vector<1x2xf32>
    %cst_85 = arith.constant 9.765625E-4 : f32
    %240 = vector.broadcast %cst_85 : f32 to vector<1x2xf32>
    %241 = arith.mulf %239, %240 : vector<1x2xf32>
    %242 = math.sqrt %226 : vector<1x2xf32>
    %243 = math.sqrt %231 : vector<1x2xf32>
    %cst_86 = arith.constant 2.000000e+00 : f32
    %244 = vector.broadcast %cst_86 : f32 to vector<1x2xf32>
    %245 = arith.mulf %244, %242 : vector<1x2xf32>
    %246 = arith.mulf %245, %243 : vector<1x2xf32>
    %cst_87 = arith.constant 3.600000e-03 : f32
    %247 = vector.broadcast %cst_87 : f32 to vector<1x2xf32>
    %248 = arith.addf %246, %247 : vector<1x2xf32>
    %249 = arith.addf %226, %231 : vector<1x2xf32>
    %cst_88 = arith.constant 3.600000e-03 : f32
    %250 = vector.broadcast %cst_88 : f32 to vector<1x2xf32>
    %251 = arith.addf %249, %250 : vector<1x2xf32>
    %252 = arith.divf %248, %251 : vector<1x2xf32>
    %cst_89 = arith.constant 1.800000e-03 : f32
    %253 = vector.broadcast %cst_89 : f32 to vector<1x2xf32>
    %254 = arith.addf %236, %253 : vector<1x2xf32>
    %255 = arith.mulf %242, %243 : vector<1x2xf32>
    %cst_90 = arith.constant 1.800000e-03 : f32
    %256 = vector.broadcast %cst_90 : f32 to vector<1x2xf32>
    %257 = arith.addf %255, %256 : vector<1x2xf32>
    %258 = arith.divf %254, %257 : vector<1x2xf32>
    %259 = arith.mulf %241, %252 : vector<1x2xf32>
    %260 = arith.mulf %259, %258 : vector<1x2xf32>
    %c0_91 = arith.constant 0 : index
    %c0_92 = arith.constant 0 : index
    %261 = vector.load %arg6[%c0_91, %c0_92] : memref<1x2xf32, #tpu.memory_space<vmem>>, vector<1x2xf32>
    tpu.vector_store %arg6[%c0_91, %c0_92], %260 {strides = array<i32>} : memref<1x2xf32, #tpu.memory_space<vmem>>, vector<1x2xf32>,
    return
  }
  func.func @transform_0(%arg0: i32) -> (i32, i32) {
    %c0_i32 = arith.constant 0 : i32
    %c0_i32_0 = arith.constant 0 : i32
    %c0_i32_1 = arith.constant 0 : i32
    return %c0_i32, %c0_i32_0 : i32, i32
  }
  func.func @transform_1(%arg0: i32) -> (i32, i32) {
    %c0_i32 = arith.constant 0 : i32
    %c0_i32_0 = arith.constant 0 : i32
    %c0_i32_1 = arith.constant 0 : i32
    return %c0_i32, %c0_i32_0 : i32, i32
  }
  func.func @transform_2(%arg0: i32) -> (i32, i32, i32) {
    %c0_i32 = arith.constant 0 : i32
    %c0_i32_0 = arith.constant 0 : i32
    %c0_i32_1 = arith.constant 0 : i32
    return %arg0, %c0_i32, %c0_i32_0 : i32, i32, i32
  }
  func.func @transform_3(%arg0: i32) -> (i32, i32, i32) {
    %c0_i32 = arith.constant 0 : i32
    %c0_i32_0 = arith.constant 0 : i32
    %c0_i32_1 = arith.constant 0 : i32
    return %arg0, %c0_i32, %c0_i32_0 : i32, i32, i32
  }
  func.func @transform_4(%arg0: i32) -> (i32, i32, i32) {
    %c0_i32 = arith.constant 0 : i32
    %c0_i32_0 = arith.constant 0 : i32
    %c0_i32_1 = arith.constant 0 : i32
    return %arg0, %c0_i32, %c0_i32_0 : i32, i32, i32
  }
  func.func @transform_5(%arg0: i32) -> (i32, i32) {
    %c0_i32 = arith.constant 0 : i32
    %c0_i32_0 = arith.constant 0 : i32
    return %arg0, %c0_i32 : i32, i32
  }
}

</mosaic_0001>

<bundles_post_ra>
// kernel: tpu_custom_call.1
= control target key start
LH: loop header
LB: loop body
LE: loop exit
PB: predicated region body
PF: predicated region fallthrough
CT: control target
= control target key end

     0   :  { %10 = vsyncpa [#allocation3], 0  ;;  %s1322_s0 = inlined_call_operand.hbm [shape: bf16[32,32], index: 0, kind: input, shape index: {}]   ;;  %s1323_s1 = inlined_call_operand.vmem [shape: bf16[64,2], index: 1, kind: input, shape index: {}]   ;;  %s1324_s2 = inlined_call_operand.vmem [shape: f32[1,32,64], index: 2, kind: input, shape index: {}]   ;;  %s1325_s3 = inlined_call_operand.hbm [shape: f32[1,32,64], index: 3, kind: input, shape index: {}]   ;;  %s1326_s4 = inlined_call_operand.hbm [shape: f32[1,32,64], index: 4, kind: input, shape index: {}]   ;;  %s1327_s5 = inlined_call_operand.hbm [shape: f32[1,2], index: 5, kind: output, shape index: {}]  }
   0x1   :  { %11 = vsyncpa [#allocation6], 0 }
   0x2   :  { %12 = vsyncpa [#allocation4], 0  ;;  %s988_s18 = smov [#allocation5]  }
   0x3   :  { %s34_s19 = sshll.u32 %s988_s18, 4  ;;  %s35_s19 = int_to_ptr.vmem [resolvable:$true] %s34_s19 }
   0x4   :  { %s910_s20 = scalar_lea.vmem %s35_s19, 512  ;;  %p915_p1 = scmp.lt.s32.totalorder %s35_s19, %s35_s19 }
   0x5   :  { %p911_p0 = scmp.ne.s32.totalorder %s35_s19, %s910_s20  ;;  %p916_p2 = scmp.lt.s32.totalorder %s910_s20, %s910_s20 }
   0x7   :  { %p917_p3 = por %p916_p2, %p915_p1 }
   0x9   :  { %p918_p4 = pnand %p917_p3, %p911_p0 }
   0xb   :  { %921 = shalt.err (!%p918_p4)
}
   0xc   :  { %s989_s21 = smov 128   ;;  %s990_s22 = smov 8  }
   0xd   :  { %40 = dma.hbm_to_vmem [thread:$0]  %s1325_s3, 512, %s35_s19, [#allocation6], %s989_s21, %s989_s21, %s990_s22  }
   0xe   :  { %s991_s25 = smov [#allocation2]  }
   0xf   :  { %s18_s26 = sshll.u32 %s991_s25, 4  ;;  %s19_s26 = int_to_ptr.vmem [resolvable:$true] %s18_s26 }
  0x10   :  { %s930_s27 = scalar_lea.vmem %s19_s26, 256  ;;  %p935_p6 = scmp.lt.s32.totalorder %s19_s26, %s19_s26 }
  0x11   :  { %p931_p5 = scmp.ne.s32.totalorder %s19_s26, %s930_s27  ;;  %p936_p7 = scmp.lt.s32.totalorder %s930_s27, %s930_s27 }
  0x13   :  { %p937_p8 = por %p936_p7, %p935_p6 }
  0x15   :  { %p938_p9 = pnand %p937_p8, %p931_p5 }
  0x17   :  { %941 = shalt.err (!%p938_p9)
}
  0x18   :  { %s992_s28 = smov 64   ;;  %s993_s29 = smov 4  }
  0x19   :  { %24 = dma.hbm_to_vmem [thread:$0]  %s1322_s0, 256, %s19_s26, [#allocation3], %s992_s28, %s992_s28, %s993_s29  }
  0x1a   :  { %s994_s3 = smov [#allocation7]  }
  0x1b   :  { %s46_s7 = sshll.u32 %s994_s3, 4  ;;  %s47_s7 = int_to_ptr.vmem [resolvable:$true] %s46_s7 }
  0x1c   :  { %s950_s8 = scalar_lea.vmem %s47_s7, 512  ;;  %p955_p11 = scmp.lt.s32.totalorder %s47_s7, %s47_s7 }
  0x1d   :  { %p951_p10 = scmp.ne.s32.totalorder %s47_s7, %s950_s8  ;;  %p956_p12 = scmp.lt.s32.totalorder %s950_s8, %s950_s8 }
  0x1f   :  { %p957_p13 = por %p956_p12, %p955_p11 }
  0x21   :  { %p958_p0 = pnand %p957_p13, %p951_p10 }
  0x23   :  { %961 = shalt.err (!%p958_p0)
}
  0x24   :  { %52 = dma.hbm_to_vmem [thread:$0]  %s1326_s4, 512, %s47_s7, [#allocation6], %s989_s21, %s989_s21, %s990_s22  }
  0x25   :  { %982 = dma.done.wait [#allocation3], 256  }
  0x26   :  { %983 = vsyncadd [#allocation3], 4294967040 }
  0x27   :  { %984 = dma.done.wait [#allocation6], 1024  }
  0x28   :  { %985 = vsyncadd [#allocation6], 4294966272  ;;  %v65_v0 = vld [vmem:[#allocation7 + $0x10] sm:$0xff]  ;;  %v66_v1 = vld [vmem:[#allocation7 + $0x18] sm:$0xff]  ;;  %v995_v3 = vmov 0.0   ;;  %vm132_vm4 = vcmask 261120  }
  0x29   :  { %vm69_vm0 = vcmp.le.f32.partialorder %v65_v0, 0.8  ;;  %vm70_vm1 = vcmp.le.f32.partialorder %v66_v1, 0.8  ;;  %v89_v2 = vld [vmem:[#allocation5 + $0x10] sm:$0xff]  ;;  %v90_v6 = vld [vmem:[#allocation5 + $0x18] sm:$0xff]  ;;  %v188_v0 = vlaneseq }
  0x2a   :  { %v778_v4 = vsel %vm69_vm0, 1.0, %v995_v3  ;;  %v779_v5 = vsel %vm70_vm1, 1.0, %v995_v3  ;;  %v63_v7 = vld [vmem:[#allocation7] sm:$0xff]  ;;  %v64_v8 = vld [vmem:[#allocation7 + $0x8] sm:$0xff]  ;;  %v880_v13 = vld [vmem:[#allocation2] sm:$0xff]   ;;  %vm111_vm5 = vcmask 523264  }
  0x2b   :  { %v1050_v9 = vmul.f32 %v778_v4, %v89_v2  ;;  %v1052_v10 = vmul.f32 %v779_v5, %v90_v6  ;;  %v87_v11 = vld [vmem:[#allocation5] sm:$0xff]  ;;  %vm67_vm2 = vcmp.le.f32.partialorder %v63_v7, 0.8  ;;  %vm68_vm3 = vcmp.le.f32.partialorder %v64_v8, 0.8  ;;  %v88_v12 = vld [vmem:[#allocation5 + $0x8] sm:$0xff]  ;;  %816 = vmatprep.mubr.msk.bf16.mxu0 %vm132_vm4, %v880_v13 }
  0x2c   :  { %v776_v15 = vsel %vm67_vm2, 1.0, %v995_v3  ;;  %v777_v16 = vsel %vm68_vm3, 1.0, %v995_v3  ;;  %v81_v20 = vld [vmem:[%s1324_s2 + $0x10] sm:$0xff]  ;;  %v82_v21 = vld [vmem:[%s1324_s2 + $0x18] sm:$0xff]  ;;  %v79_v24 = vld [vmem:[%s1324_s2] sm:$0xff]  ;;  %s997_s17 = smov 3  }
  0x2d   :  { %v870_v14 = vpack.i.bf16 %v1052_v10, %v1050_v9  ;;  %v1058_v17 = vmul.f32 %v776_v15, %v87_v11  ;;  %v1060_v18 = vmul.f32 %v777_v16, %v88_v12  ;;  %v1073_v22 = vmul.f32 %v779_v5, %v82_v21  ;;  %v80_v25 = vld [vmem:[%s1324_s2 + $0x8] sm:$0xff]  ;;  %s996_s2 = smov 5   ;;  %s998_s18 = smov 2   ;;  %v882_v45 = vld [vmem:[%s1323_s1 + $0x18] sm:$0xff]   ;;  %v883_v46 = vld [vmem:[%s1323_s1 + $0x10] sm:$0xff]  }
  0x2e   :  { %v1075_v23 = vmul.f32 %v778_v4, %v81_v20  ;;  %v1083_v29 = vmul.f32 %v777_v16, %v80_v25  ;;  %v1085_v30 = vmul.f32 %v776_v15, %v79_v24  ;;  %v881_v40 = vld [vmem:[#allocation2 + $0x8] sm:$0xff]   ;;  %s999_s19 = smov 1   ;;  %s1000_s20 = smov 127   ;;  %844 = vmatprep.subr.bf16.mxu1 %v882_v45  ;;  %v885_v48 = vld [vmem:[%s1323_s1] sm:$0xff]   ;;  %v189_v4 = vand.u32 127, %v188_v0 }
  0x2f   :  { %871 = vrot.lane.b32.xlu0 %v870_v14, %s992_s28  ;;  %v875_v19 = vpack.i.bf16 %v1060_v18, %v1058_v17  ;;  %s1001_s21 = smov 126   ;;  %s1002_s22 = smov 125   ;;  %848 = vmatpush3.bf16.msra.mxu1 %v882_v45  ;;  %v884_v47 = vld [vmem:[%s1323_s1 + $0x8] sm:$0xff]   ;;  %vm673_vm0 = vcmask 15360  }
  0x30   :  { %s1003_s23 = smov 124   ;;  %845 = vmatprep.subr.bf16.mxu1 %v883_v46  ;;  %v194_v7 = vand.u32 31, %v189_v4  ;;  %s1005_s1 = smov [#allocation8]  }
  0x32   :  { %v206_v12 = vadd.s32 4294967291, %v194_v7  ;;  %v227_v14 = vadd.s32 4294967292, %v194_v7  ;;  %v248_v16 = vadd.s32 4294967293, %v194_v7  ;;  %v269_v20 = vadd.s32 4294967294, %v194_v7 }
  0x33   :  { %876 = vrot.lane.b32.xlu0 %v875_v19, %s992_s28  ;;  %849 = vmatpush3.bf16.msra.mxu1 %v883_v46  ;;  %v290_v24 = vadd.s32 4294967295, %v194_v7 }
  0x34   :  { %846 = vmatprep.subr.bf16.mxu1 %v884_v47  ;;  %vm207_vm6 = vcmp.ge.s32.totalorder %v206_v12, 0  ;;  %vm228_vm7 = vcmp.ge.s32.totalorder %v227_v14, 0  ;;  %vm249_vm8 = vcmp.ge.s32.totalorder %v248_v16, 0  ;;  %vm270_vm9 = vcmp.ge.s32.totalorder %v269_v20, 0 }
  0x35   :  { %v210_v21 = vsel %vm207_vm6, 0.0010283801, %v995_v3  ;;  %vm291_vm10 = vcmp.ge.s32.totalorder %v290_v24, 0 }
  0x37   :  { %850 = vmatpush3.bf16.msra.mxu1 %v884_v47 }
  0x38   :  { %847 = vmatprep.subr.bf16.mxu1 %v885_v48 }
  0x3b   :  { %851 = vmatpush3.bf16.msra.mxu1 %v885_v48 }
  0xa1   :  { %v872_v26 = vpop.permute.xlu0 %871 }
  0xa2   :  { %v874_v27 = vunpack.i.h.bf16 %v872_v26  ;;  %v873_v28 = vunpack.i.l.bf16 %v872_v26 }
  0xa4   :  { %v114_v31 = vsel %vm111_vm5, %v1075_v23, %v873_v28  ;;  %v115_v32 = vsel %vm111_vm5, %v1073_v22, %v874_v27  ;;  %v231_v27 = vsel %vm228_vm7, 0.007598758, %v995_v3 }
  0xa5   :  { %v877_v33 = vpop.permute.xlu0 %876  ;;  %v121_v34 = vpack.c.bf16 %v115_v32, %v114_v31  ;;  %v311_v32 = vadd.s32 1, %v194_v7 }
  0xa6   :  { %v879_v35 = vunpack.i.h.bf16 %v877_v33  ;;  %v878_v36 = vunpack.i.l.bf16 %v877_v33 }
  0xa7   :  { %812 = vmatprep.subr.bf16.mxu0 %v121_v34  ;;  %vm313_vm11 = vcmp.lt.s32.totalorder %v311_v32, 32 }
  0xa8   :  { %813 = vmatpush3.bf16.msra.mxu0 %v121_v34  ;;  %v112_v37 = vsel %vm111_vm5, %v1085_v30, %v878_v36  ;;  %v113_v38 = vsel %vm111_vm5, %v1083_v29, %v879_v35  ;;  %v252_v35 = vsel %vm249_vm8, 0.036000773, %v995_v3  ;;  %v332_v36 = vadd.s32 2, %v194_v7 }
  0xa9   :  { %v120_v39 = vpack.c.bf16 %v113_v38, %v112_v37  ;;  %v315_v20 = vsel %vm313_vm11, 0.21300554, %v995_v3 }
  0xaa   :  { %vm334_vm12 = vcmp.lt.s32.totalorder %v332_v36, 32 }
  0xab   :  { %814 = vmatprep.subr.bf16.mxu0 %v120_v39 }
  0xac   :  { %815 = vmatpush3.bf16.msra.mxu0 %v120_v39  ;;  %v353_v39 = vadd.s32 3, %v194_v7 }
  0xad   :  { %820 = vmatprep.subr.bf16.mxu0 %v882_v45 }
  0xae   :  { %vm355_vm13 = vcmp.lt.s32.totalorder %v353_v39, 32 }
  0xaf   :  { %817 = vmatmul.mubr.msk.bf16.vlgmr.msra.gmra.mxu0 %vm132_vm4, %v881_v40 }
  0xb0   :  { %821 = vmatpush3.bf16.msra.mxu0 %v882_v45 }
  0xb1   :  { %822 = vmatprep.subr.bf16.mxu0 %v883_v46 }
  0xb4   :  { %823 = vmatpush3.bf16.msra.mxu0 %v883_v46 }
  0xb5   :  { %824 = vmatprep.subr.bf16.mxu0 %v884_v47 }
  0xb8   :  { %825 = vmatpush3.bf16.msra.mxu0 %v884_v47  ;;  %v273_v47 = vsel %vm270_vm9, 0.10936069, %v995_v3 }
  0xb9   :  { %826 = vmatprep.subr.bf16.mxu0 %v885_v48 }
  0xbc   :  { %827 = vmatpush3.bf16.msra.mxu0 %v885_v48 }
 0x16f   :  { %v1096_v41 = vpop.f32.mrf.mxu0 }
 0x170   :  { %215 = vrot.lane.b32.xlu0 %v1096_v41, %s996_s2  ;;  %v204_v45 = vmul.f32 0.26601171, %v1096_v41 }
 0x171   :  { %v1100_v42 = vpop.f32.mrf.mxu0 }
 0x172   :  { %211 = vrot.lane.b32.xlu1 %v1100_v42, %s996_s2  ;;  %v202_v31 = vmul.f32 0.26601171, %v1100_v42 }
 0x173   :  { %v1106_v43 = vpop.f32.mrf.mxu0 }
 0x174   :  { %236 = vrot.lane.b32.xlu0 %v1096_v41, %s993_s29  ;;  %v205_v4 = vmul.f32 0.26601171, %v1106_v43 }
 0x175   :  { %v1135_v44 = vpop.f32.mrf.mxu0 }
 0x176   :  { %217 = vrot.lane.b32.xlu1 %v1106_v43, %s996_s2 }
 0x178   :  { %257 = vrot.lane.b32.xlu0 %v1096_v41, %s997_s17 }
 0x17a   :  { %238 = vrot.lane.b32.xlu1 %v1106_v43, %s993_s29 }
 0x17c   :  { %278 = vrot.lane.b32.xlu0 %v1096_v41, %s998_s18 }
 0x17e   :  { %259 = vrot.lane.b32.xlu1 %v1106_v43, %s997_s17 }
 0x180   :  { %299 = vrot.lane.b32.xlu0 %v1096_v41, %s999_s19 }
 0x182   :  { %280 = vrot.lane.b32.xlu1 %v1106_v43, %s998_s18 }
 0x184   :  { %320 = vrot.lane.b32.xlu0 %v1096_v41, %s1000_s20 }
 0x186   :  { %301 = vrot.lane.b32.xlu1 %v1106_v43, %s999_s19 }
 0x188   :  { %341 = vrot.lane.b32.xlu0 %v1096_v41, %s1001_s21 }
 0x18a   :  { %322 = vrot.lane.b32.xlu1 %v1106_v43, %s1000_s20 }
 0x18c   :  { %362 = vrot.lane.b32.xlu0 %v1096_v41, %s1002_s22 }
 0x18e   :  { %343 = vrot.lane.b32.xlu1 %v1106_v43, %s1001_s21 }
 0x190   :  { %383 = vrot.lane.b32.xlu0 %v1096_v41, %s1003_s23 }
 0x192   :  { %364 = vrot.lane.b32.xlu1 %v1106_v43, %s1002_s22 }
 0x194   :  { %232 = vrot.lane.b32.xlu0 %v1100_v42, %s993_s29 }
 0x196   :  { %385 = vrot.lane.b32.xlu1 %v1106_v43, %s1003_s23 }
 0x198   :  { %253 = vrot.lane.b32.xlu0 %v1100_v42, %s997_s17 }
 0x19a   :  { %213 = vrot.lane.b32.xlu1 %v1135_v44, %s996_s2 }
 0x19c   :  { %274 = vrot.lane.b32.xlu0 %v1100_v42, %s998_s18 }
 0x19e   :  { %234 = vrot.lane.b32.xlu1 %v1135_v44, %s993_s29  ;;  %s1004_s29 = smov 123  }
 0x1a0   :  { %295 = vrot.lane.b32.xlu0 %v1100_v42, %s999_s19 }
 0x1a2   :  { %255 = vrot.lane.b32.xlu1 %v1135_v44, %s997_s17 }
 0x1a4   :  { %316 = vrot.lane.b32.xlu0 %v1100_v42, %s1000_s20 }
 0x1a6   :  { %276 = vrot.lane.b32.xlu1 %v1135_v44, %s998_s18 }
 0x1a8   :  { %337 = vrot.lane.b32.xlu0 %v1100_v42, %s1001_s21 }
 0x1aa   :  { %297 = vrot.lane.b32.xlu1 %v1135_v44, %s999_s19 }
 0x1ac   :  { %358 = vrot.lane.b32.xlu0 %v1100_v42, %s1002_s22 }
 0x1ae   :  { %318 = vrot.lane.b32.xlu1 %v1135_v44, %s1000_s20 }
 0x1b0   :  { %379 = vrot.lane.b32.xlu0 %v1100_v42, %s1003_s23 }
 0x1b2   :  { %339 = vrot.lane.b32.xlu1 %v1135_v44, %s1001_s21 }
 0x1b4   :  { %400 = vrot.lane.b32.xlu0 %v1100_v42, %s1004_s29  ;;  %v1213_v42 = vsel %vm291_vm10, 0.21300554, %v995_v3 }
 0x1b6   :  { %360 = vrot.lane.b32.xlu1 %v1135_v44, %s1002_s22 }
 0x1b8   :  { %404 = vrot.lane.b32.xlu0 %v1096_v41, %s1004_s29 }
 0x1ba   :  { %381 = vrot.lane.b32.xlu1 %v1135_v44, %s1003_s23 }
 0x1be   :  { %402 = vrot.lane.b32.xlu1 %v1135_v44, %s1004_s29 }
 0x1c2   :  { %406 = vrot.lane.b32.xlu1 %v1106_v43, %s1004_s29 }
 0x1e2   :  { %v216_v49 = vpop.permute.xlu0 %215 }
 0x1e3   :  { %v221_v34 = vmul.f32 %v216_v49, %v210_v21 }
 0x1e4   :  { %v212_v50 = vpop.permute.xlu1 %211 }
 0x1e5   :  { %v219_v26 = vmul.f32 %v212_v50, %v210_v21  ;;  %v225_v0 = vadd.f32 %v221_v34, %v204_v45  ;;  %v336_v34 = vsel %vm334_vm12, 0.10936069, %v995_v3 }
 0x1e6   :  { %v237_v51 = vpop.permute.xlu0 %236 }
 0x1e7   :  { %v223_v38 = vadd.f32 %v219_v26, %v202_v31  ;;  %v242_v46 = vmul.f32 %v237_v51, %v231_v27  ;;  %v395_v26 = vadd.s32 5, %v194_v7 }
 0x1e8   :  { %v1176_v52 = vpop.permute.xlu1 %217 }
 0x1e9   :  { %v246_v51 = vadd.f32 %v242_v46, %v225_v0  ;;  %vm397_vm15 = vcmp.lt.s32.totalorder %v395_v26, 32 }
 0x1ea   :  { %v258_v53 = vpop.permute.xlu0 %257 }
 0x1ec   :  { %v1178_v54 = vpop.permute.xlu1 %238 }
 0x1ed   :  { %v243_v39 = vmul.f32 %v1178_v54, %v231_v27 }
 0x1ee   :  { %v1180_v55 = vpop.permute.xlu0 %278 }
 0x1ef   :  { %v284_v16 = vmul.f32 %v1180_v55, %v273_v47 }
 0x1f0   :  { %v1182_v56 = vpop.permute.xlu1 %259 }
 0x1f2   :  { %v1184_v57 = vpop.permute.xlu0 %299 }
 0x1f4   :  { %v1186_v58 = vpop.permute.xlu1 %280 }
 0x1f6   :  { %v1188_v59 = vpop.permute.xlu0 %320 }
 0x1f8   :  { %v1190_v60 = vpop.permute.xlu1 %301 }
 0x1fa   :  { %v1192_v61 = vpop.permute.xlu0 %341 }
 0x1fb   :  { %v347_v0 = vmul.f32 %v1192_v61, %v336_v34 }
 0x1fc   :  { %v1194_v62 = vpop.permute.xlu1 %322 }
 0x1fe   :  { %v1196_v63 = vpop.permute.xlu0 %362 }
 0x200   :  { %v1198_v1 = vpop.permute.xlu1 %343 }
 0x202   :  { %v1200_v2 = vpop.permute.xlu0 %383 }
 0x204   :  { %v1202_v5 = vpop.permute.xlu1 %364 }
 0x206   :  { %v233_v6 = vpop.permute.xlu0 %232 }
 0x207   :  { %v240_v33 = vmul.f32 %v233_v6, %v231_v27  ;;  %v263_v6 = vmul.f32 %v258_v53, %v252_v35 }
 0x208   :  { %v1204_v8 = vpop.permute.xlu1 %385 }
 0x209   :  { %v244_v50 = vadd.f32 %v240_v33, %v223_v38  ;;  %v267_v53 = vadd.f32 %v263_v6, %v246_v51  ;;  %v305_v33 = vmul.f32 %v1184_v57, %v1213_v42 }
 0x20a   :  { %v254_v11 = vpop.permute.xlu0 %253 }
 0x20b   :  { %v261_v40 = vmul.f32 %v254_v11, %v252_v35  ;;  %v374_v11 = vadd.s32 4, %v194_v7 }
 0x20c   :  { %v214_v13 = vpop.permute.xlu1 %213 }
 0x20d   :  { %v265_v14 = vadd.f32 %v261_v40, %v244_v50  ;;  %v220_v31 = vmul.f32 %v214_v13, %v210_v21  ;;  %vm376_vm14 = vcmp.lt.s32.totalorder %v374_v11, 32  ;;  %v288_v13 = vadd.f32 %v284_v16, %v267_v53 }
 0x20e   :  { %v275_v15 = vpop.permute.xlu0 %274  ;;  %v399_v16 = vsel %vm397_vm15, 0.0010283801, %v995_v3 }
 0x20f   :  { %v282_v49 = vmul.f32 %v275_v15, %v273_v47  ;;  %v203_v15 = vmul.f32 0.26601171, %v1135_v44  ;;  %v222_v44 = vmul.f32 %v1176_v52, %v210_v21 }
 0x210   :  { %v235_v19 = vpop.permute.xlu1 %234 }
 0x211   :  { %v286_v32 = vadd.f32 %v282_v49, %v265_v14  ;;  %v241_v38 = vmul.f32 %v235_v19, %v231_v27  ;;  %v224_v57 = vadd.f32 %v220_v31, %v203_v15  ;;  %v309_v49 = vadd.f32 %v305_v33, %v288_v13 }
 0x212   :  { %v296_v25 = vpop.permute.xlu0 %295  ;;  %v378_v19 = vsel %vm376_vm14, 0.007598758, %v995_v3  ;;  %v226_v14 = vadd.f32 %v222_v44, %v205_v4 }
 0x213   :  { %v303_v41 = vmul.f32 %v296_v25, %v1213_v42  ;;  %v1226_v25 = vsel %vm355_vm13, 0.036000773, %v995_v3  ;;  %v245_v52 = vadd.f32 %v241_v38, %v224_v57  ;;  %v389_v4 = vmul.f32 %v1200_v2, %v378_v19 }
 0x214   :  { %v256_v28 = vpop.permute.xlu1 %255  ;;  %v368_v54 = vmul.f32 %v1196_v63, %v1226_v25  ;;  %v247_v15 = vadd.f32 %v243_v39, %v226_v14  ;;  %v306_v3 = vmul.f32 %v1190_v60, %v1213_v42  ;;  %v348_v60 = vmul.f32 %v1198_v1, %v336_v34 }
 0x215   :  { %v307_v7 = vadd.f32 %v303_v41, %v286_v32  ;;  %v262_v46 = vmul.f32 %v256_v28, %v252_v35  ;;  %v264_v41 = vmul.f32 %v1182_v56, %v252_v35 }
 0x216   :  { %v317_v37 = vpop.permute.xlu0 %316 }
 0x217   :  { %v324_v43 = vmul.f32 %v317_v37, %v315_v20  ;;  %v326_v37 = vmul.f32 %v1188_v59, %v315_v20  ;;  %v266_v61 = vadd.f32 %v262_v46, %v245_v52  ;;  %v268_v26 = vadd.f32 %v264_v41, %v247_v15 }
 0x218   :  { %v277_v48 = vpop.permute.xlu1 %276 }
 0x219   :  { %v328_v36 = vadd.f32 %v324_v43, %v307_v7  ;;  %v283_v21 = vmul.f32 %v277_v48, %v273_v47  ;;  %v330_v28 = vadd.f32 %v326_v37, %v309_v49  ;;  %v285_v48 = vmul.f32 %v1186_v58, %v273_v47 }
 0x21a   :  { %v338_v12 = vpop.permute.xlu0 %337  ;;  %v327_v58 = vmul.f32 %v1194_v62, %v315_v20  ;;  %v369_v62 = vmul.f32 %v1202_v5, %v1226_v25  ;;  %v390_v49 = vmul.f32 %v1204_v8, %v378_v19 }
 0x21b   :  { %v345_v40 = vmul.f32 %v338_v12, %v336_v34  ;;  %v351_v31 = vadd.f32 %v347_v0, %v330_v28  ;;  %v287_v56 = vadd.f32 %v283_v21, %v266_v61  ;;  %v289_v7 = vadd.f32 %v285_v48, %v268_v26 }
 0x21c   :  { %v298_v24 = vpop.permute.xlu1 %297 }
 0x21d   :  { %v349_v12 = vadd.f32 %v345_v40, %v328_v36  ;;  %v304_v27 = vmul.f32 %v298_v24, %v1213_v42  ;;  %v372_v33 = vadd.f32 %v368_v54, %v351_v31  ;;  %v310_v37 = vadd.f32 %v306_v3, %v289_v7 }
 0x21e   :  { %v359_v55 = vpop.permute.xlu0 %358 }
 0x21f   :  { %v366_v50 = vmul.f32 %v359_v55, %v1226_v25  ;;  %v308_v55 = vadd.f32 %v304_v27, %v287_v56  ;;  %v393_v2 = vadd.f32 %v389_v4, %v372_v33  ;;  %v331_v36 = vadd.f32 %v327_v58, %v310_v37 }
 0x220   :  { %v319_v45 = vpop.permute.xlu1 %318 }
 0x221   :  { %v370_v11 = vadd.f32 %v366_v50, %v349_v12  ;;  %v325_v35 = vmul.f32 %v319_v45, %v315_v20  ;;  %v352_v50 = vadd.f32 %v348_v60, %v331_v36 }
 0x222   :  { %v380_v6 = vpop.permute.xlu0 %379 }
 0x223   :  { %v387_v59 = vmul.f32 %v380_v6, %v378_v19  ;;  %v329_v40 = vadd.f32 %v325_v35, %v308_v55 }
 0x224   :  { %v340_v51 = vpop.permute.xlu1 %339 }
 0x225   :  { %v391_v43 = vadd.f32 %v387_v59, %v370_v11  ;;  %v346_v24 = vmul.f32 %v340_v51, %v336_v34  ;;  %v373_v34 = vadd.f32 %v369_v62, %v352_v50 }
 0x226   :  { %v401_v32 = vpop.permute.xlu0 %400 }
 0x227   :  { %v408_v53 = vmul.f32 %v401_v32, %v399_v16  ;;  %v350_v45 = vadd.f32 %v346_v24, %v329_v40 }
 0x228   :  { %v361_v63 = vpop.permute.xlu1 %360 }
 0x229   :  { %v1245_v38 = vadd.f32 %v408_v53, %v391_v43  ;;  %v367_v44 = vmul.f32 %v361_v63, %v1226_v25  ;;  %v394_v25 = vadd.f32 %v390_v49, %v373_v34 }
 0x22a   :  { %v405_v47 = vpop.permute.xlu0 %404 }
 0x22b   :  { %v410_v13 = vmul.f32 %v405_v47, %v399_v16  ;;  %424 = vrot.lane.b32.xlu0 %v1245_v38, %s992_s28  ;;  %v371_v20 = vadd.f32 %v367_v44, %v350_v45  ;;  %v452_v1 = vmul.f32 %v1245_v38, %v1245_v38  ;;  %v416_v52 = vsub.f32 %v1085_v30, %v1245_v38 }
 0x22c   :  { %v382_v42 = vpop.permute.xlu1 %381  ;;  %v440_v62 = vmul.f32 2.0, %v1245_v38 }
 0x22d   :  { %v1252_v57 = vadd.f32 %v410_v13, %v393_v2  ;;  %v388_v46 = vmul.f32 %v382_v42, %v378_v19  ;;  %v500_v14 = vmul.f32 %v416_v52, %v416_v52 }
 0x22f   :  { %428 = vrot.lane.b32.xlu0 %v1252_v57, %s992_s28  ;;  %v392_v0 = vadd.f32 %v388_v46, %v371_v20  ;;  %v454_v8 = vmul.f32 %v1252_v57, %v1252_v57  ;;  %v418_v19 = vsub.f32 %v1075_v23, %v1252_v57  ;;  %v442_v34 = vmul.f32 2.0, %v1252_v57 }
 0x230   :  { %v403_v39 = vpop.permute.xlu1 %402 }
 0x231   :  { %v409_v6 = vmul.f32 %v403_v39, %v399_v16  ;;  %v502_v51 = vmul.f32 %v418_v19, %v418_v19 }
 0x233   :  { %v1263_v21 = vadd.f32 %v409_v6, %v392_v0  ;;  %460 = vrot.lane.b32.xlu0 %v452_v1, %s992_s28 }
 0x234   :  { %v407_v5 = vpop.permute.xlu1 %406 }
 0x235   :  { %v417_v12 = vsub.f32 %v1083_v29, %v1263_v21  ;;  %v411_v59 = vmul.f32 %v407_v5, %v399_v16  ;;  %426 = vrot.lane.b32.xlu1 %v1263_v21, %s992_s28  ;;  %v453_v23 = vmul.f32 %v1263_v21, %v1263_v21  ;;  %v441_v50 = vmul.f32 2.0, %v1263_v21 }
 0x237   :  { %v1274_v30 = vadd.f32 %v411_v59, %v394_v25  ;;  %464 = vrot.lane.b32.xlu0 %v454_v8, %s992_s28  ;;  %v501_v41 = vmul.f32 %v417_v12, %v417_v12 }
 0x239   :  { %v419_v28 = vsub.f32 %v1073_v22, %v1274_v30  ;;  %430 = vrot.lane.b32.xlu1 %v1274_v30, %s992_s28  ;;  %v520_v29 = vpack.c.bf16 %v501_v41, %v500_v14  ;;  %v455_v61 = vmul.f32 %v1274_v30, %v1274_v30  ;;  %v443_v25 = vmul.f32 2.0, %v1274_v30 }
 0x23b   :  { %v503_v16 = vmul.f32 %v419_v28, %v419_v28  ;;  %828 = vmatprep.mubr.msk.bf16.mxu0 %vm111_vm5, %v520_v29 }
 0x23d   :  { %462 = vrot.lane.b32.xlu1 %v453_v23, %s992_s28  ;;  %v521_v54 = vpack.c.bf16 %v503_v16, %v502_v51 }
 0x23f   :  { %829 = vmatmul.mubr.msk.bf16.vlgmr.msra.gmra.mxu0 %vm111_vm5, %v521_v54 }
 0x241   :  { %466 = vrot.lane.b32.xlu1 %v455_v61, %s992_s28  ;;  %s766_s28 = sshll.u32 %s1005_s1, 4  ;;  %s767_s28 = int_to_ptr.vmem [resolvable:$true] %s766_s28 }
 0x242   :  { %s962_s8 = scalar_lea.vmem %s767_s28, 16  ;;  %s966_s9 = scalar_lea.vmem %s767_s28, 32 }
 0x243   :  { %p963_p1 = scmp.ne.s32.totalorder %s767_s28, %s962_s8  ;;  %p967_p2 = scmp.lt.s32.totalorder %s767_s28, %s767_s28 }
 0x244   :  { %p968_p3 = scmp.lt.s32.totalorder %s966_s9, %s962_s8 }
 0x246   :  { %p969_p4 = por %p968_p3, %p967_p2 }
 0x248   :  { %p970_p5 = pnand %p969_p4, %p963_p1 }
 0x29d   :  { %v425_v22 = vpop.permute.xlu0 %424 }
 0x29e   :  { %v436_v48 = vsub.f32 %v1058_v17, %v425_v22  ;;  %v444_v0 = vmul.f32 %v440_v62, %v425_v22 }
 0x2a0   :  { %v504_v26 = vmul.f32 %v436_v48, %v436_v48  ;;  %v508_v17 = vmul.f32 %v436_v48, %v416_v52 }
 0x2a1   :  { %v429_v27 = vpop.permute.xlu0 %428 }
 0x2a2   :  { %v438_v35 = vsub.f32 %v1050_v9, %v429_v27 }
 0x2a4   :  { %v506_v7 = vmul.f32 %v438_v35, %v438_v35  ;;  %v510_v37 = vmul.f32 %v438_v35, %v418_v19  ;;  %v446_v19 = vmul.f32 %v442_v34, %v429_v27 }
 0x2a5   :  { %v461_v11 = vpop.permute.xlu0 %460 }
 0x2a6   :  { %v472_v15 = vadd.f32 %v461_v11, %v452_v1 }
 0x2a7   :  { %v427_v31 = vpop.permute.xlu1 %426 }
 0x2a8   :  { %v476_v4 = vadd.f32 0.0004, %v472_v15  ;;  %v437_v32 = vsub.f32 %v1060_v18, %v427_v31  ;;  %v445_v6 = vmul.f32 %v441_v50, %v427_v31 }
 0x2a9   :  { %v465_v56 = vpop.permute.xlu0 %464 }
 0x2aa   :  { %v474_v43 = vadd.f32 %v465_v56, %v454_v8  ;;  %v505_v3 = vmul.f32 %v437_v32, %v437_v32  ;;  %886 = vrcp.f32 %v476_v4  ;;  %v509_v55 = vmul.f32 %v437_v32, %v417_v12 }
 0x2ab   :  { %v431_v53 = vpop.permute.xlu1 %430  ;;  %v448_v8 = vadd.f32 0.0004, %v444_v0  ;;  %v449_v14 = vadd.f32 0.0004, %v445_v6 }
 0x2ac   :  { %v478_v63 = vadd.f32 0.0004, %v474_v43  ;;  %v439_v33 = vsub.f32 %v1052_v10, %v431_v53  ;;  %v522_v24 = vpack.c.bf16 %v505_v3, %v504_v26  ;;  %v524_v9 = vpack.c.bf16 %v509_v55, %v508_v17 }
 0x2ad   :  { %v447_v38 = vmul.f32 %v443_v25, %v431_v53 }
 0x2ae   :  { %v507_v58 = vmul.f32 %v439_v33, %v439_v33  ;;  %832 = vmatprep.mubr.msk.bf16.mxu1 %vm111_vm5, %v522_v24  ;;  %888 = vrcp.f32 %v478_v63  ;;  %v511_v13 = vmul.f32 %v439_v33, %v419_v28 }
 0x2af   :  { %v463_v47 = vpop.permute.xlu1 %462  ;;  %v451_v54 = vadd.f32 0.0004, %v447_v38 }
 0x2b0   :  { %v523_v18 = vpack.c.bf16 %v507_v58, %v506_v7  ;;  %v473_v2 = vadd.f32 %v463_v47, %v453_v23  ;;  %v525_v42 = vpack.c.bf16 %v511_v13, %v510_v37  ;;  %v450_v23 = vadd.f32 0.0004, %v446_v19 }
 0x2b2   :  { %v477_v40 = vadd.f32 0.0004, %v473_v2  ;;  %833 = vmatmul.mubr.msk.bf16.vlgmr.msra.gmra.mxu1 %vm111_vm5, %v523_v18 }
 0x2b3   :  { %v467_v44 = vpop.permute.xlu1 %466  ;;  %836 = vmatprep.mubr.msk.bf16.mxu1 %vm111_vm5, %v524_v9 }
 0x2b4   :  { %890 = vrcp.f32 %v477_v40  ;;  %v475_v10 = vadd.f32 %v467_v44, %v455_v61 }
 0x2b6   :  { %v479_v60 = vadd.f32 0.0004, %v475_v10 }
 0x2b7   :  { %v887_v45 = vpop.eup %886 }
 0x2b8   :  { %892 = vrcp.f32 %v479_v60  ;;  %v484_v46 = vmul.f32 %v887_v45, %v476_v4 }
 0x2ba   :  { %837 = vmatmul.mubr.msk.bf16.gmra.mxu1 %vm111_vm5, %v525_v42  ;;  %v488_v20 = vsub.f32 2.0, %v484_v46 }
 0x2bb   :  { %v889_v36 = vpop.eup %888 }
 0x2bc   :  { %v486_v39 = vmul.f32 %v889_v36, %v478_v63  ;;  %v492_v52 = vmul.f32 %v887_v45, %v488_v20 }
 0x2be   :  { %v490_v5 = vsub.f32 2.0, %v486_v39  ;;  %v496_v21 = vmul.f32 %v492_v52, %v448_v8 }
 0x2c0   :  { %v494_v29 = vmul.f32 %v889_v36, %v490_v5 }
 0x2c1   :  { %v891_v49 = vpop.eup %890 }
 0x2c2   :  { %v485_v1 = vmul.f32 %v891_v49, %v477_v40  ;;  %v498_v22 = vmul.f32 %v494_v29, %v450_v23 }
 0x2c4   :  { %v489_v12 = vsub.f32 2.0, %v485_v1 }
 0x2c5   :  { %v893_v59 = vpop.eup %892 }
 0x2c6   :  { %v493_v41 = vmul.f32 %v891_v49, %v489_v12  ;;  %v487_v28 = vmul.f32 %v893_v59, %v479_v60 }
 0x2c8   :  { %v497_v51 = vmul.f32 %v493_v41, %v449_v14  ;;  %v491_v16 = vsub.f32 2.0, %v487_v28 }
 0x2ca   :  { %v495_v61 = vmul.f32 %v893_v59, %v491_v16  ;;  %v526_v57 = vpack.c.bf16 %v497_v51, %v496_v21 }
 0x2cc   :  { %v499_v11 = vmul.f32 %v495_v61, %v451_v54  ;;  %840 = vmatprep.mubr.msk.bf16.mxu1 %vm111_vm5, %v526_v57 }
 0x2ce   :  { %v527_v30 = vpack.c.bf16 %v499_v11, %v498_v22 }
 0x2d0   :  { %841 = vmatmul.mubr.msk.bf16.gmra.mxu1 %vm111_vm5, %v527_v30  ;;  %vm758_vm5 = vcmask 8192  }
 0x2ff   :  { %v830_v27 = vpop.f32.mrf.mxu0 }
 0x300   :  { %v677_v35 = vsel %vm673_vm0, %v830_v27, 0.0 }
 0x301   :  { %v610_v15 = vpop.f32.mrf.mxu0 }
 0x302   :  { %v674_v32 = vsel %vm673_vm0, %v610_v15, 0.0 }
 0x303   :  { %v831_v48 = vpop.f32.mrf.mxu0 }
 0x304   :  { %v679_v53 = vsel %vm673_vm0, %v831_v48, 0.0 }
 0x305   :  { %v613_v31 = vpop.f32.mrf.mxu0 }
 0x306   :  { %v675_v4 = vsel %vm673_vm0, %v613_v31, 0.0 }
 0x307   :  { %v676_v56 = vadd.f32 %v675_v4, %v674_v32 }
 0x309   :  { %v678_v43 = vadd.f32 %v677_v35, %v676_v56 }
 0x30b   :  { %v680_v26 = vadd.f32 %v679_v53, %v678_v43 }
 0x30d   :  { %v681_v3 = vrot.slane %v680_v26, 4 }
 0x30f   :  { %v682_v63 = vadd.f32 %v681_v3, %v680_v26 }
 0x311   :  { %v683_v55 = vrot.slane %v682_v63, 2 }
 0x313   :  { %v684_v58 = vadd.f32 %v683_v55, %v682_v63 }
 0x315   :  { %v685_v44 = vrot.slane %v684_v58, 1 }
 0x317   :  { %v686_v45 = vadd.f32 %v685_v44, %v684_v58 }
 0x319   :  { %v687_v20 = vmul.f32 0.0009765625, %v686_v45 }
 0x31b   :  { %894 = vrsqrt.f32 %v687_v20  ;;  %vm732_vm1 = vcmp.eq.f32.partialorder %v687_v20, inf  ;;  %vm734_vm2 = vcmp.eq.f32.partialorder %v687_v20, 0.0  ;;  %v735_v31 = vand.u32 2147483648, %v687_v20 }
 0x328   :  { %v895_v41 = vpop.eup %894 }
 0x329   :  { %v731_v23 = vmul.f32 %v895_v41, %v687_v20 }
 0x32b   :  { %v733_v15 = vsel %vm732_vm1, %v687_v20, %v731_v23 }
 0x32c   :  { %v736_v43 = vsel %vm734_vm2, %v735_v31, %v733_v15 }
 0x372   :  { %v834_v33 = vpop.f32.mrf.mxu1 }
 0x373   :  { %v691_v40 = vsel %vm673_vm0, %v834_v33, 0.0 }
 0x374   :  { %v626_v24 = vpop.f32.mrf.mxu1 }
 0x375   :  { %v688_v47 = vsel %vm673_vm0, %v626_v24, 0.0 }
 0x376   :  { %v835_v7 = vpop.f32.mrf.mxu1 }
 0x377   :  { %v693_v37 = vsel %vm673_vm0, %v835_v7, 0.0 }
 0x378   :  { %v629_v17 = vpop.f32.mrf.mxu1 }
 0x379   :  { %v689_v18 = vsel %vm673_vm0, %v629_v17, 0.0  ;;  %v744_v17 = vmul.f32 2.0, %v736_v43 }
 0x37a   :  { %v690_v2 = vadd.f32 %v689_v18, %v688_v47  ;;  %v838_v9 = vpop.f32.mrf.mxu1 }
 0x37b   :  { %v705_v52 = vsel %vm673_vm0, %v838_v9, 0.0 }
 0x37c   :  { %v692_v13 = vadd.f32 %v691_v40, %v690_v2  ;;  %v642_v10 = vpop.f32.mrf.mxu1 }
 0x37d   :  { %v702_v0 = vsel %vm673_vm0, %v642_v10, 0.0 }
 0x37e   :  { %v694_v60 = vadd.f32 %v693_v37, %v692_v13  ;;  %v839_v42 = vpop.f32.mrf.mxu1 }
 0x37f   :  { %v707_v12 = vsel %vm673_vm0, %v839_v42, 0.0 }
 0x380   :  { %v695_v46 = vrot.slane %v694_v60, 4  ;;  %v645_v62 = vpop.f32.mrf.mxu1 }
 0x381   :  { %v703_v39 = vsel %vm673_vm0, %v645_v62, 0.0 }
 0x382   :  { %v696_v36 = vadd.f32 %v695_v46, %v694_v60  ;;  %v704_v1 = vadd.f32 %v703_v39, %v702_v0 }
 0x384   :  { %v697_v50 = vrot.slane %v696_v36, 2  ;;  %v706_v25 = vadd.f32 %v705_v52, %v704_v1 }
 0x386   :  { %v698_v49 = vadd.f32 %v697_v50, %v696_v36  ;;  %v708_v59 = vadd.f32 %v707_v12, %v706_v25 }
 0x388   :  { %v699_v6 = vrot.slane %v698_v49, 1  ;;  %v709_v14 = vrot.slane %v708_v59, 4 }
 0x38a   :  { %v700_v34 = vadd.f32 %v699_v6, %v698_v49  ;;  %v710_v51 = vadd.f32 %v709_v14, %v708_v59 }
 0x38c   :  { %v701_v5 = vmul.f32 0.0009765625, %v700_v34  ;;  %v711_v30 = vrot.slane %v710_v51, 2 }
 0x38e   :  { %896 = vrsqrt.f32 %v701_v5  ;;  %v747_v57 = vadd.f32 %v701_v5, %v687_v20  ;;  %vm739_vm3 = vcmp.eq.f32.partialorder %v701_v5, inf  ;;  %v742_v4 = vand.u32 2147483648, %v701_v5 }
 0x38f   :  { %vm741_vm4 = vcmp.eq.f32.partialorder %v701_v5, 0.0  ;;  %v712_v26 = vadd.f32 %v711_v30, %v710_v51 }
 0x390   :  { %v842_v8 = vpop.f32.mrf.mxu1  ;;  %v748_v35 = vadd.f32 0.0036, %v747_v57 }
 0x391   :  { %v719_v54 = vsel %vm673_vm0, %v842_v8, 0.0  ;;  %v713_v24 = vrot.slane %v712_v26, 1 }
 0x392   :  { %v658_v19 = vpop.f32.mrf.mxu1  ;;  %898 = vrcp.f32 %v748_v35 }
 0x393   :  { %v716_v21 = vsel %vm673_vm0, %v658_v19, 0.0  ;;  %v714_v47 = vadd.f32 %v713_v24, %v712_v26 }
 0x394   :  { %v843_v38 = vpop.f32.mrf.mxu1 }
 0x395   :  { %v721_v11 = vsel %vm673_vm0, %v843_v38, 0.0  ;;  %v715_v9 = vmul.f32 0.0009765625, %v714_v47 }
 0x396   :  { %v661_v28 = vpop.f32.mrf.mxu1 }
 0x397   :  { %v717_v29 = vsel %vm673_vm0, %v661_v28, 0.0  ;;  %v751_v37 = vadd.f32 0.0018, %v715_v9 }
 0x398   :  { %v718_v16 = vadd.f32 %v717_v29, %v716_v21 }
 0x39a   :  { %v720_v61 = vadd.f32 %v719_v54, %v718_v16 }
 0x39b   :  { %v897_v22 = vpop.eup %896 }
 0x39c   :  { %v722_v27 = vadd.f32 %v721_v11, %v720_v61  ;;  %v738_v48 = vmul.f32 %v897_v22, %v701_v5 }
 0x39e   :  { %v723_v32 = vrot.slane %v722_v27, 4  ;;  %v740_v56 = vsel %vm739_vm3, %v701_v5, %v738_v48 }
 0x39f   :  { %v743_v53 = vsel %vm741_vm4, %v742_v4, %v740_v56  ;;  %v899_v13 = vpop.eup %898 }
 0x3a0   :  { %v724_v3 = vadd.f32 %v723_v32, %v722_v27  ;;  %v752_v63 = vmul.f32 %v743_v53, %v736_v43  ;;  %v745_v18 = vmul.f32 %v744_v17, %v743_v53 }
 0x3a2   :  { %v725_v33 = vrot.slane %v724_v3, 2  ;;  %v753_v55 = vadd.f32 0.0018, %v752_v63  ;;  %v746_v40 = vadd.f32 0.0036, %v745_v18 }
 0x3a4   :  { %v726_v7 = vadd.f32 %v725_v33, %v724_v3  ;;  %900 = vrcp.f32 %v753_v55  ;;  %v750_v10 = vmul.f32 %v899_v13, %v746_v40 }
 0x3a6   :  { %v727_v58 = vrot.slane %v726_v7, 1 }
 0x3a8   :  { %v728_v2 = vadd.f32 %v727_v58, %v726_v7 }
 0x3aa   :  { %v729_v44 = vmul.f32 0.0009765625, %v728_v2 }
 0x3ac   :  { %v756_v45 = vmul.f32 %v750_v10, %v729_v44 }
 0x3b1   :  { %v901_v60 = vpop.eup %900 }
 0x3b2   :  { %v755_v42 = vmul.f32 %v901_v60, %v751_v37 }
 0x3b4   :  { %v757_v46 = vmul.f32 %v756_v45, %v755_v42 }
 0x3b6   :  { %759 = vst.msk [vmem:[#allocation8] sm:$0x1] %vm758_vm5, %v757_v46 }
 0x3b7   :  { %973 = shalt.err (!%p970_p5)
}
 0x3b8   :  { %769 = dma.vmem_to_hbm [thread:$0]  %s767_s28, 16, %s1327_s5, [#allocation4]  }
 0x3b9   :  { %986 = dma.done.wait [#allocation4], 16  }
 0x3ba   :  { %987 = vsyncadd [#allocation4], 4294967280 }
 0x3bb   :  { %773 = vsyncpa [#allocation3], 1 }
 0x3bc   :  { %774 = vsyncpa [#allocation6], 1 }
 0x3bd   :  { %775 = vsyncpa [#allocation4], 1 }

</bundles_post_ra>
